<compile_context>
chip_gen: v6e
topology: v6e:2x2x1
jax: 0.10.0
libtpu: 0.0.40
codegen_flags: <defaults>
</compile_context>

<pallas_src>
import functools

import jax
import jax.numpy as jnp
from jax.experimental import pallas as pl
from jax.experimental.pallas import tpu as pltpu


def _sdpa_kernel(q_ref, k_ref, v_ref, out_ref, attn_ref, *, inv_temperature):
    # Block of `block_b` batch/head elements: (Bt, Lq, Dk) / (Bt, Lk, Dk) / (Bt, Lk, Dv)
    # Fold the 1/temperature scale into q (Lq x Dk tile << Lq x Lk scores tile).
    q = q_ref[...] * jnp.asarray(inv_temperature, dtype=q_ref.dtype)
    k = k_ref[...]
    v = v_ref[...]

    # scores[b, i, j] = sum_d q[b, i, d] * k[b, j, d]
    # Contract on the shared last axis -> no explicit k transpose (XLU pass avoided).
    scores = jnp.einsum("bqd,bkd->bqk", q, k, preferred_element_type=jnp.float32)

    # Numerically stable softmax over the key axis, all elementwise math in f32
    # (keeps v5e's f32-only VPU/EUP happy; only matmul inputs would ever be bf16).
    m = jnp.max(scores, axis=-1, keepdims=True)
    e = jnp.exp(scores - m)
    s = jnp.sum(e, axis=-1, keepdims=True)

    # EUP approximate reciprocal (occupies the otherwise-idle EUP slot) followed
    # by Newton-Raphson refinement on the tiny (Bt, Lq, 1) column so the softmax
    # normalization stays at full f32 accuracy.
    inv = pl.reciprocal(s, approx=True)
    inv = inv * (2.0 - s * inv)
    inv = inv * (2.0 - s * inv)
    attn = e * inv

    # NOTE: Lk is not a multiple of 128 at demo shapes, so this store is masked;
    # it is kept because the module's contract is to return the attention matrix.
    attn_ref[...] = attn.astype(attn_ref.dtype)

    # output = attn @ v  (MXU, f32 accumulation)
    out = jnp.einsum("bqk,bkd->bqd", attn.astype(v.dtype), v,
                     preferred_element_type=jnp.float32)
    out_ref[...] = out.astype(out_ref.dtype)


def _pick_block_b(B, target=8):
    """Largest divisor of B that is <= target, preferring to leave >= 2 grid
    steps so the parallel batch axis can be split across TensorCores (v7x)."""
    cap = min(target, B)
    if B >= 2:
        cap = min(cap, max(1, B // 2))
    for bt in range(cap, 0, -1):
        if B % bt == 0:
            return bt
    return 1


def scaled_dot_product_attention(q, k, v, temperature, *, block_b=None):
    """q: [B, Lq, Dk], k: [B, Lk, Dk], v: [B, Lk, Dv] -> (output, attn)."""
    B, Lq, Dk = q.shape
    _, Lk, _ = k.shape
    _, _, Dv = v.shape

    if block_b is None:
        block_b = _pick_block_b(B)
    assert B % block_b == 0, f"block_b={block_b} must divide B={B}"
    grid = (B // block_b,)

    kernel = functools.partial(_sdpa_kernel, inv_temperature=1.0 / float(temperature))

    grid_spec = pltpu.PrefetchScalarGridSpec(
        num_scalar_prefetch=0,
        grid=grid,
        in_specs=[
            pl.BlockSpec((block_b, Lq, Dk), lambda b: (b, 0, 0)),
            pl.BlockSpec((block_b, Lk, Dk), lambda b: (b, 0, 0)),
            pl.BlockSpec((block_b, Lk, Dv), lambda b: (b, 0, 0)),
        ],
        out_specs=[
            pl.BlockSpec((block_b, Lq, Dv), lambda b: (b, 0, 0)),
            pl.BlockSpec((block_b, Lq, Lk), lambda b: (b, 0, 0)),
        ],
    )

    itemsize = q.dtype.itemsize
    cost = pl.CostEstimate(
        flops=2 * B * Lq * Lk * (Dk + Dv),
        transcendentals=B * Lq * Lk,
        bytes_accessed=itemsize * (
            B * Lq * Dk            # q
            + B * Lk * Dk          # k
            + B * Lk * Dv          # v
            + B * Lq * Dv          # output
            + B * Lq * Lk          # attn
        ),
    )

    out, attn = pl.pallas_call(
        kernel,
        out_shape=(
            jax.ShapeDtypeStruct((B, Lq, Dv), q.dtype),
            jax.ShapeDtypeStruct((B, Lq, Lk), q.dtype),
        ),
        grid_spec=grid_spec,
        compiler_params=pltpu.CompilerParams(
            dimension_semantics=("parallel",),
        ),
        cost_estimate=cost,
    )(q, k, v)
    return out, attn


def _reference(q, k, v, temperature):
    attn = jnp.einsum("bqd,bkd->bqk", q, k) / temperature
    attn = jax.nn.softmax(attn, axis=-1)
    out = jnp.einsum("bqk,bkd->bqd", attn, v)
    return out, attn


if __name__ == "__main__":
    # Shapes implied by the module: [n_head * batch_size, len, d]
    n_head, batch_size = 4, 2
    B = n_head * batch_size
    len_q, len_k = 16, 16
    d_k, d_v = 32, 32
    temperature = float(d_k) ** 0.5

    key = jax.random.PRNGKey(0)
    kq, kk, kv = jax.random.split(key, 3)
    q = jax.random.normal(kq, (B, len_q, d_k), dtype=jnp.float32)
    k = jax.random.normal(kk, (B, len_k, d_k), dtype=jnp.float32)
    v = jax.random.normal(kv, (B, len_k, d_v), dtype=jnp.float32)

    out, attn = scaled_dot_product_attention(q, k, v, temperature)
    out = jax.block_until_ready(out)
    attn = jax.block_until_ready(attn)

    ref_out, ref_attn = _reference(q, k, v, temperature)
    assert jnp.allclose(out, ref_out, atol=1e-5, rtol=1e-5), "output mismatch"
    assert jnp.allclose(attn, ref_attn, atol=1e-5, rtol=1e-5), "attn mismatch"

    print("KERNEL_OK")
</pallas_src>

<mosaic_0001>
module attributes {stable_mosaic.version = 11 : i64} {
  func.func @_sdpa_kernel(%arg0: i32, %arg1: memref<4x16x32xf32, #tpu.memory_space<vmem>>, %arg2: memref<4x16x32xf32, #tpu.memory_space<vmem>>, %arg3: memref<4x16x32xf32, #tpu.memory_space<vmem>>, %arg4: memref<4x16x32xf32, #tpu.memory_space<vmem>>, %arg5: memref<4x16x16xf32, #tpu.memory_space<vmem>>) attributes {dimension_semantics = [#tpu.dimension_semantics<parallel>], iteration_bounds = array<i64: 2>, scalar_prefetch = 0 : i64, scratch_operands = 0 : i64, tpu.core_type = #tpu.core_type<tc>, window_params = [{transform_indices = @transform_0, window_bounds = array<i64: 4, 16, 32>}, {transform_indices = @transform_1, window_bounds = array<i64: 4, 16, 32>}, {transform_indices = @transform_2, window_bounds = array<i64: 4, 16, 32>}, {transform_indices = @transform_3, window_bounds = array<i64: 4, 16, 32>}, {transform_indices = @transform_4, window_bounds = array<i64: 4, 16, 16>}]} {
    %c0 = arith.constant 0 : index
    %c0_0 = arith.constant 0 : index
    %c0_1 = arith.constant 0 : index
    %0 = vector.load %arg1[%c0, %c0_0, %c0_1] : memref<4x16x32xf32, #tpu.memory_space<vmem>>, vector<4x16x32xf32>
    %cst = arith.constant 0.176776692 : f32
    %1 = vector.broadcast %cst : f32 to vector<4x16x32xf32>
    %2 = arith.mulf %0, %1 : vector<4x16x32xf32>
    %c0_2 = arith.constant 0 : index
    %c0_3 = arith.constant 0 : index
    %c0_4 = arith.constant 0 : index
    %3 = vector.load %arg2[%c0_2, %c0_3, %c0_4] : memref<4x16x32xf32, #tpu.memory_space<vmem>>, vector<4x16x32xf32>
    %c0_5 = arith.constant 0 : index
    %c0_6 = arith.constant 0 : index
    %c0_7 = arith.constant 0 : index
    %4 = vector.load %arg3[%c0_5, %c0_6, %c0_7] : memref<4x16x32xf32, #tpu.memory_space<vmem>>, vector<4x16x32xf32>
    "tpu.trace_start"() <{level = 10 : i32, message = "bqd,bkd->bqk"}> : () -> ()
    %cst_8 = arith.constant dense<0.000000e+00> : vector<4x16x16xf32>
    %5 = tpu.matmul %2, %3, %cst_8 {dimension_numbers = #tpu.dot_dimension_numbers<[2], [2], [1], [1], [0, 0, 0, 1, 1, 1], [0], [0]>} : vector<4x16x32xf32>, vector<4x16x32xf32>, vector<4x16x16xf32> -> vector<4x16x16xf32>
    "tpu.trace_stop"() : () -> ()
    %cst_9 = arith.constant dense<0xFF800000> : vector<4x16xf32>
    %6 = vector.multi_reduction <maximumf>, %5, %cst_9 [2] : vector<4x16x16xf32> to vector<4x16xf32>
    %7 = vector.shape_cast %6 : vector<4x16xf32> to vector<4x16x1xf32>
    %8 = vector.broadcast %7 : vector<4x16x1xf32> to vector<4x16x16xf32>
    %9 = arith.subf %5, %8 : vector<4x16x16xf32>
    %10 = math.exp %9 : vector<4x16x16xf32>
    %cst_10 = arith.constant dense<0.000000e+00> : vector<4x16xf32>
    %11 = vector.multi_reduction <add>, %10, %cst_10 [2] : vector<4x16x16xf32> to vector<4x16xf32>
    %12 = vector.shape_cast %11 : vector<4x16xf32> to vector<4x16x1xf32>
    %13 = tpu.reciprocal %12 {approx = true} : vector<4x16x1xf32> -> vector<4x16x1xf32>
    %14 = arith.mulf %12, %13 : vector<4x16x1xf32>
    %cst_11 = arith.constant 2.000000e+00 : f32
    %15 = vector.broadcast %cst_11 : f32 to vector<4x16x1xf32>
    %16 = arith.subf %15, %14 : vector<4x16x1xf32>
    %17 = arith.mulf %13, %16 : vector<4x16x1xf32>
    %18 = arith.mulf %12, %17 : vector<4x16x1xf32>
    %cst_12 = arith.constant 2.000000e+00 : f32
    %19 = vector.broadcast %cst_12 : f32 to vector<4x16x1xf32>
    %20 = arith.subf %19, %18 : vector<4x16x1xf32>
    %21 = arith.mulf %17, %20 : vector<4x16x1xf32>
    %22 = vector.broadcast %21 : vector<4x16x1xf32> to vector<4x16x16xf32>
    %23 = arith.mulf %10, %22 : vector<4x16x16xf32>
    %c0_13 = arith.constant 0 : index
    %c0_14 = arith.constant 0 : index
    %c0_15 = arith.constant 0 : index
    %24 = vector.load %arg5[%c0_13, %c0_14, %c0_15] : memref<4x16x16xf32, #tpu.memory_space<vmem>>, vector<4x16x16xf32>
    tpu.vector_store %arg5[%c0_13, %c0_14, %c0_15], %23 {strides = array<i32>} : memref<4x16x16xf32, #tpu.memory_space<vmem>>, vector<4x16x16xf32>,
    "tpu.trace_start"() <{level = 10 : i32, message = "bqk,bkd->bqd"}> : () -> ()
    %cst_16 = arith.constant dense<0.000000e+00> : vector<4x16x32xf32>
    %25 = tpu.matmul %23, %4, %cst_16 {dimension_numbers = #tpu.dot_dimension_numbers<[2], [1], [1], [2], [0, 0, 0, 1, 1, 2], [0], [0]>} : vector<4x16x16xf32>, vector<4x16x32xf32>, vector<4x16x32xf32> -> vector<4x16x32xf32>
    "tpu.trace_stop"() : () -> ()
    %c0_17 = arith.constant 0 : index
    %c0_18 = arith.constant 0 : index
    %c0_19 = arith.constant 0 : index
    %26 = vector.load %arg4[%c0_17, %c0_18, %c0_19] : memref<4x16x32xf32, #tpu.memory_space<vmem>>, vector<4x16x32xf32>
    tpu.vector_store %arg4[%c0_17, %c0_18, %c0_19], %25 {strides = array<i32>} : memref<4x16x32xf32, #tpu.memory_space<vmem>>, vector<4x16x32xf32>,
    return
  }
  func.func @transform_0(%arg0: i32) -> (i32, i32, i32) {
    %c0_i32 = arith.constant 0 : i32
    %c0_i32_0 = arith.constant 0 : i32
    %c0_i32_1 = arith.constant 0 : i32
    return %arg0, %c0_i32, %c0_i32_0 : i32, i32, i32
  }
  func.func @transform_1(%arg0: i32) -> (i32, i32, i32) {
    %c0_i32 = arith.constant 0 : i32
    %c0_i32_0 = arith.constant 0 : i32
    %c0_i32_1 = arith.constant 0 : i32
    return %arg0, %c0_i32, %c0_i32_0 : i32, i32, i32
  }
  func.func @transform_2(%arg0: i32) -> (i32, i32, i32) {
    %c0_i32 = arith.constant 0 : i32
    %c0_i32_0 = arith.constant 0 : i32
    %c0_i32_1 = arith.constant 0 : i32
    return %arg0, %c0_i32, %c0_i32_0 : i32, i32, i32
  }
  func.func @transform_3(%arg0: i32) -> (i32, i32, i32) {
    %c0_i32 = arith.constant 0 : i32
    %c0_i32_0 = arith.constant 0 : i32
    %c0_i32_1 = arith.constant 0 : i32
    return %arg0, %c0_i32, %c0_i32_0 : i32, i32, i32
  }
  func.func @transform_4(%arg0: i32) -> (i32, i32, i32) {
    %c0_i32 = arith.constant 0 : i32
    %c0_i32_0 = arith.constant 0 : i32
    %c0_i32_1 = arith.constant 0 : i32
    return %arg0, %c0_i32, %c0_i32_0 : i32, i32, i32
  }
}

</mosaic_0001>

<bundles_post_ra>
// kernel: tpu_custom_call.1
= control target key start
LH: loop header
LB: loop body
LE: loop exit
PB: predicated region body
PF: predicated region fallthrough
CT: control target
= control target key end

     0   :  { %s2260_s0 = inlined_call_operand.hbm [shape: f32[8,16,32], index: 0, kind: input, shape index: {}]   ;;  %s2261_s1 = inlined_call_operand.hbm [shape: f32[8,16,32], index: 1, kind: input, shape index: {}]   ;;  %s2262_s2 = inlined_call_operand.hbm [shape: f32[8,16,32], index: 2, kind: input, shape index: {}]   ;;  %s2263_s3 = inlined_call_operand.hbm [shape: f32[8,16,32], index: 3, kind: output, shape index: {0}]   ;;  %s2264_s4 = inlined_call_operand.hbm [shape: f32[8,16,16], index: 4, kind: output, shape index: {1}]  }
   0x1   :  { %2271 = sst [smem:[#allocation16_spill]] %s2260_s0 }
   0x2   :  { %2272 = sst [smem:[#allocation17_spill]] %s2261_s1 }
   0x3   :  { %10 = vsyncpa [#allocation3], 0 }
   0x4   :  { %12 = vsyncpa [#allocation3 + $0x1], 0 }
   0x5   :  { %13 = vsyncpa [#allocation6], 0 }
   0x6   :  { %15 = vsyncpa [#allocation6 + $0x1], 0 }
   0x7   :  { %16 = vsyncpa [#allocation4], 0 }
   0x8   :  { %18 = vsyncpa [#allocation4 + $0x1], 0 }
   0x9   :  { %19 = vsyncpa [#allocation10], 0 }
   0xa   :  { %21 = vsyncpa [#allocation10 + $0x1], 0  ;;  %s1823_s15 = smov 0   ;;  %s1825_s16 = smov 0  }
   0xb   :  { %s1827_s17 = smov 0   ;;  %s1829_s18 = smov 0  }
   0xc LB: > { %s1844_s19 = sadd.s32 4294967295, %s1787_s18   ;;  %s1355_s20 = sadd.s32 4294967294, %s1787_s18   ;;  %s1787_s18 = sphi %s1829_s18, %s2294_s18   ;;  %s1783_s17 = sphi %s1827_s17, %s2293_s17   ;;  %s1779_s16 = sphi %s1825_s16, %s2292_s16   ;;  %s1775_s15 = sphi %s1823_s15, %s2291_s15  }
   0xd   : > { %s1848_s21 = sadd.s32 1, %s1787_s18   ;;  %s34_s22 = sadd.s32 1, %s1783_s17 }
   0xe   : > { %s31_s23 = ssub.s32 %s1787_s18, %s1848_s21  ;;  %p41_p0 = scmp.ne.s32.totalorder %s1783_s17, %s1779_s16 }
   0xf   : > { %p32_p1 = scmp.eq.s32.totalorder %s31_s23, 0  ;;  %p42_p2 = scmp.eq.s32.totalorder %s1787_s18, 0 }
  0x10   : > { %p47_p3 = scmp.ne.s32.totalorder %s1779_s16, %s1775_s15  ;;  %p48_p4 = scmp.eq.s32.totalorder %s1844_s19, 0 }
  0x11   : > { %s1860_s24 = scalar_select %p32_p1, %s1783_s17, %s34_s22  }
  0x12   : > { %p43_p5 = por %p42_p2, %p41_p0  ;;  %p1862_p6 = por %p48_p4, %p47_p3 }
  0x13   : > { %2273 = sst [smem:[#allocation15_spill]] %s1860_s24  ;;  %p123_p7 = scmp.eq.s32.totalorder %s1844_s19, 1 }
  0x14   : > { %s2274_s25 = scalar_select %p1862_p6, 1, 0 }
  0x15   : > { %p129_p8 = scmp.eq.s32.totalorder %s1355_s20, 1  ;;  %p1535_p10 = scmp.lt.s32.totalorder %s1787_s18, 2 }
  0x16   : > { %p1869_p11 = por %p123_p7, %p41_p0  ;;  %s175_s28 = sand.u32 1, %s1783_s17  }
  0x17   : > { %p1873_p12 = por %p129_p8, %p47_p3  ;;  %s1879_s29 = sshll.u32 %s1787_s18, 10 }
  0x18   : > { %s2275_s26 = scalar_select %p1869_p11, 1, 0 }
  0x19   : > { %s2276_s27 = scalar_select %p1873_p12, 1, 0 }
  0x1a   : > { %s1883_s30 = sshll.u32 %s175_s28, 6  ;;  %p1885_p13 = pnand %p1535_p10, %p43_p5 }
  0x1b   : > { %s197_s6 = sand.u32 1, %s1787_s18   ;;  %s2278_s1 = sld [smem:[#allocation17_spill]] }
  0x1c   : > { %s201_s10 = scalar_lea.vmem [#allocation5], %s1883_s30  ;;  %s1900_s12 = scalar_lea.sflag [#allocation6], %s197_s6 }
  0x1d   : > { %s209_s11 = sshll.u32 %s201_s10, 4  ;;  %p1906_p2 = pneg %p1885_p13  ;;  %s1897_s11 = int_to_ptr.vmem [resolvable:$true] %s209_s11 }
  0x21   : > { %s1894_s9 = scalar_lea.hbm %s2278_s1, %s1879_s29  ;;  %s1610_s23 = scalar_lea.hbm %s2278_s1, 2048 }
  0x22   : > { %s1605_s13 = scalar_lea.hbm %s1894_s9, 1024  ;;  %p1611_p5 = scmp.lt.s32.totalorder %s1894_s9, %s2278_s1 }
  0x23   : > { %p1606_p1 = scmp.ne.s32.totalorder %s1894_s9, %s1605_s13  ;;  %p1612_p7 = scmp.lt.s32.totalorder %s1610_s23, %s1605_s13 }
  0x25   : > { %p1608_p3 = pnand %p1906_p2, %p1606_p1  ;;  %p1613_p8 = por %p1612_p7, %p1611_p5 }
  0x27   : > { %p1609_p4 = pneg %p1608_p3 }
  0x29   : > { %p1614_p10 = pnand %p1613_p8, %p1609_p4 }
  0x2b   : > { %1617 = shalt.err (!%p1614_p10)
}
  0x2c   : > { %s1618_s6 = scalar_lea.vmem %s1897_s11, 1024  ;;  %s1789_s10 = smov [#allocation5]  }
  0x2d   : > { %p1619_p9 = scmp.ne.s32.totalorder %s1897_s11, %s1618_s6  ;;  %s1623_s20 = sshll.u32 %s1789_s10, 4  ;;  %s1624_s20 = int_to_ptr.vmem [resolvable:$false] %s1623_s20 }
  0x2e   : > { %s1625_s22 = scalar_lea.vmem %s1624_s20, 2048  ;;  %p1626_p0 = scmp.lt.s32.totalorder %s1897_s11, %s1624_s20 }
  0x2f   : > { %p1621_p1 = pnand %p1619_p9, %p1906_p2  ;;  %p1627_p12 = scmp.lt.s32.totalorder %s1625_s22, %s1618_s6 }
  0x31   : > { %p1622_p3 = pneg %p1621_p1  ;;  %p1628_p11 = por %p1627_p12, %p1626_p0 }
  0x33   : > { %p1629_p6 = pnand %p1628_p11, %p1622_p3 }
  0x35   : > { %1632 = shalt.err (!%p1629_p6)
}
  0x36   : > { %s2267_s13 = smov 128   ;;  %s2269_s23 = smov 8  }
  0x37   : > { %1524 = dma.hbm_to_vmem [thread:$0]  (!%p1885_p13), %s1894_s9, 1024, %s1897_s11, %s1900_s12, %s2267_s13, %s2267_s13, %s2269_s23  }
  0x38   : > { %p239_p9 = scmp.lt.s32.totalorder %s1787_s18, 3  ;;  %s2280_s0 = sld [smem:[#allocation16_spill]] }
  0x39   : > { %p2281_p6 = scmp.ge.s32.totalorder %s1787_s18, 1  ;;  %s179_s20 = scalar_lea.vmem [#allocation2], %s1883_s30 }
  0x3a   : > { %s187_s22 = sshll.u32 %s179_s20, 4  ;;  %s176_s9 = scalar_lea.sflag [#allocation3], %s175_s28  ;;  %s1946_s22 = int_to_ptr.vmem [resolvable:$true] %s187_s22 }
  0x3b   : > { %p1941_p11 = pnand %p2281_p6, %p239_p9 }
  0x3d   : > { %s2282_s10 = scalar_select %p1941_p11, 1, 0 }
  0x3e   : > { %s1937_s6 = scalar_lea.hbm %s2280_s0, %s1879_s29  ;;  %s1638_s13 = scalar_lea.hbm %s2280_s0, 2048 }
  0x3f   : > { %s1633_s11 = scalar_lea.hbm %s1937_s6, 1024  ;;  %p1639_p5 = scmp.lt.s32.totalorder %s1937_s6, %s2280_s0 }
  0x40   : > { %p1634_p12 = scmp.ne.s32.totalorder %s1937_s6, %s1633_s11  ;;  %p1640_p7 = scmp.lt.s32.totalorder %s1638_s13, %s1633_s11 }
  0x42   : > { %p1636_p0 = pnand %p1634_p12, %p1906_p2  ;;  %p1641_p8 = por %p1640_p7, %p1639_p5 }
  0x44   : > { %p1637_p4 = pneg %p1636_p0 }
  0x46   : > { %p1642_p10 = pnand %p1641_p8, %p1637_p4 }
  0x48   : > { %1645 = shalt.err (!%p1642_p10)
}
  0x49   : > { %s1646_s28 = scalar_lea.vmem %s1946_s22, 1024  ;;  %s1792_s20 = smov [#allocation2]  }
  0x4a   : > { %p1647_p1 = scmp.ne.s32.totalorder %s1946_s22, %s1646_s28  ;;  %s1651_s7 = sshll.u32 %s1792_s20, 4  ;;  %s1652_s7 = int_to_ptr.vmem [resolvable:$false] %s1651_s7 }
  0x4b   : > { %s1653_s8 = scalar_lea.vmem %s1652_s7, 2048  ;;  %p1654_p6 = scmp.lt.s32.totalorder %s1946_s22, %s1652_s7 }
  0x4c   : > { %p1649_p3 = pnand %p1647_p1, %p1906_p2  ;;  %p1655_p12 = scmp.lt.s32.totalorder %s1653_s8, %s1646_s28 }
  0x4e   : > { %p1650_p9 = pneg %p1649_p3  ;;  %p1656_p0 = por %p1655_p12, %p1654_p6 }
  0x50   : > { %p1657_p11 = pnand %p1656_p0, %p1650_p9 }
  0x52   : > { %1660 = shalt.err (!%p1657_p11)
}
  0x53   : > { %s2283_s1 = smov 8   ;;  %s2284_s13 = smov 128  }
  0x54   : > { %1521 = dma.hbm_to_vmem [thread:$0]  (!%p1885_p13), %s1937_s6, 1024, %s1946_s22, %s176_s9, %s2284_s13, %s2284_s13, %s2283_s1  }
  0x55   : > { %s1977_s20 = scalar_lea.hbm %s2262_s2, %s1879_s29  ;;  %s223_s28 = scalar_lea.vmem [#allocation7], %s1883_s30 }
  0x56   : > { %s231_s7 = sshll.u32 %s223_s28, 4  ;;  %s1661_s8 = scalar_lea.hbm %s1977_s20, 1024  ;;  %s232_s7 = int_to_ptr.vmem [resolvable:$true] %s231_s7 }
  0x57   : > { %p1662_p11 = scmp.ne.s32.totalorder %s1977_s20, %s1661_s8  ;;  %s1666_s6 = scalar_lea.hbm %s2262_s2, 2048 }
  0x58   : > { %p1667_p7 = scmp.lt.s32.totalorder %s1977_s20, %s2262_s2  ;;  %p1668_p8 = scmp.lt.s32.totalorder %s1666_s6, %s1661_s8 }
  0x59   : > { %p1664_p4 = pnand %p1662_p11, %p1906_p2 }
  0x5a   : > { %p1669_p10 = por %p1668_p8, %p1667_p7 }
  0x5b   : > { %p1665_p5 = pneg %p1664_p4 }
  0x5d   : > { %p1670_p1 = pnand %p1669_p10, %p1665_p5 }
  0x5f   : > { %1673 = shalt.err (!%p1670_p1)
}
  0x60   : > { %s1674_s29 = scalar_lea.vmem %s232_s7, 1024  ;;  %s1793_s30 = smov [#allocation7]  }
  0x61   : > { %p1675_p3 = scmp.ne.s32.totalorder %s232_s7, %s1674_s29  ;;  %s1679_s23 = sshll.u32 %s1793_s30, 4  ;;  %s1680_s23 = int_to_ptr.vmem [resolvable:$false] %s1679_s23 }
  0x62   : > { %s1681_s11 = scalar_lea.vmem %s1680_s23, 2048  ;;  %p1682_p12 = scmp.lt.s32.totalorder %s232_s7, %s1680_s23 }
  0x63   : > { %p1677_p9 = pnand %p1675_p3, %p1906_p2  ;;  %p1683_p0 = scmp.lt.s32.totalorder %s1681_s11, %s1674_s29 }
  0x65   : > { %p1678_p6 = pneg %p1677_p9  ;;  %p1684_p11 = por %p1683_p0, %p1682_p12 }
  0x67   : > { %p1685_p4 = pnand %p1684_p11, %p1678_p6 }
  0x69   : > { %1688 = shalt.err (!%p1685_p4)
}
  0x6a   : > { %1527 = dma.hbm_to_vmem [thread:$0]  (!%p1885_p13), %s1977_s20, 1024, %s232_s7, %s1900_s12, %s2284_s13, %s2284_s13, %s2283_s1  }
  0x6b   : > { %p2285_p2 = scmp.ne.s32.totalorder %s2282_s10, 0 }
  0x6c   : > { %s2003_s0 = sand.u32 (!%p2285_p2), 1, %s1779_s16   ;;  %p2286_p5 = scmp.ne.s32.totalorder (!%p2285_p2), %s2274_s25, 0 }
  0x6d   : > { %243 = sbr.rel (%p2285_p2) target bundleno = 868 (0x364), region = 32  ;;  %s2006_s24 = sshll.u32 (!%p2285_p2), %s2003_s0, 6 }
  0x6e   : > { %s246_s14 = scalar_lea.sflag (!%p2285_p2), [#allocation3], %s2003_s0  ;;  %s2010_s5 = scalar_lea.vmem (!%p2285_p2), [#allocation2], %s2006_s24 }
  0x72   : > { %1758 = dma.done.wait (%p2286_p5), %s246_s14, 1024  }
  0x73   : > { %1760 = vsyncadd (%p2286_p5), %s246_s14, 4294966272  ;;  %s254_s12 = sand.u32 1, %s1844_s19   ;;  %s2018_s1 = scalar_lea.vmem [#allocation5], %s2006_s24 }
  0x74   : > { %s255_s10 = scalar_lea.sflag [#allocation6], %s254_s12 }
  0x75   : > { %1762 = dma.done.wait (%p2286_p5), %s255_s10, 2048  }
  0x76   : > { %1764 = vsyncadd (%p2286_p5), %s255_s10, 4294965248  ;;  %vm344_vm0 = vcmask 261120   ;;  %v329_v0 = vld [vmem:[%s2018_s1 + $0x8] sm:$0xff]  ;;  %v331_v1 = vld [vmem:[%s2018_s1 + $0x18] sm:$0xff]  ;;  %vm693_vm1 = vcmask 130048   ;;  %s2105_s25 = scalar_lea.vmem [#allocation7], %s2006_s24 }
  0x77   : > { %v328_v2 = vld [vmem:[%s2018_s1] sm:$0xff]  ;;  %1452 = vmatprep.subr.msk.mxu0 %vm344_vm0, %v329_v0  ;;  %1459 = vmatprep.subr.msk.mxu1 %vm344_vm0, %v331_v1  ;;  %v330_v3 = vld [vmem:[%s2018_s1 + $0x10] sm:$0xff]  ;;  %v313_v6 = vld [vmem:[%s2010_s5 + $0x8] sm:$0xff]  ;;  %s2124_s13 = scalar_lea.vmem [#allocation9], %s2006_s24  ;;  %s1417_s20 = sshll.u32 %s1844_s19, 10 }
  0x78   : > { %v312_v4 = vld [vmem:[%s2010_s5] sm:$0xff]  ;;  %1453 = vmatpush3.xpose.msk.msra.mxu0 %vm344_vm0, %v329_v0  ;;  %1460 = vmatpush3.xpose.msk.msra.mxu1 %vm344_vm0, %v331_v1  ;;  %v314_v7 = vld [vmem:[%s2010_s5 + $0x10] sm:$0xff]  ;;  %v315_v9 = vld [vmem:[%s2010_s5 + $0x18] sm:$0xff]  ;;  %v321_v12 = vmul.f32 0.17677669, %v313_v6  ;;  %s2169_s8 = scalar_lea.hbm %s2264_s4, %s1417_s20  ;;  %s1207_s6 = sshll.u32 %s2124_s13, 4  ;;  %s2172_s6 = int_to_ptr.vmem [resolvable:$true] %s1207_s6 }
  0x79   : > { %v320_v5 = vmul.f32 0.17677669, %v312_v4  ;;  %1454 = vmatprep.subr.msk.mxu0 %vm344_vm0, %v328_v2  ;;  %1461 = vmatprep.subr.msk.mxu1 %vm344_vm0, %v330_v3  ;;  %v322_v8 = vmul.f32 0.17677669, %v314_v7  ;;  %v333_v10 = vld [vmem:[%s2018_s1 + $0x28] sm:$0xff]  ;;  %v335_v11 = vld [vmem:[%s2018_s1 + $0x38] sm:$0xff] }
  0x7a   : > { %v323_v13 = vmul.f32 0.17677669, %v315_v9  ;;  %v316_v14 = vld [vmem:[%s2010_s5 + $0x20] sm:$0xff]  ;;  %v318_v15 = vld [vmem:[%s2010_s5 + $0x30] sm:$0xff]  ;;  %v317_v20 = vld [vmem:[%s2010_s5 + $0x28] sm:$0xff]  ;;  %s1176_s22 = scalar_lea.sflag [#allocation10], %s2003_s0 }
  0x7b   : > { %1456 = vmatprep.mubr.msk.f32.mxu0 %vm344_vm0, %v320_v5  ;;  %1463 = vmatprep.mubr.msk.f32.mxu1 %vm344_vm0, %v322_v8  ;;  %v332_v16 = vld [vmem:[%s2018_s1 + $0x20] sm:$0xff]  ;;  %v334_v17 = vld [vmem:[%s2018_s1 + $0x30] sm:$0xff]  ;;  %v324_v18 = vmul.f32 0.17677669, %v316_v14  ;;  %v326_v19 = vmul.f32 0.17677669, %v318_v15 }
  0x7c   : > { %1455 = vmatpush3.xpose.msk.msra.mxu0 %vm344_vm0, %v328_v2  ;;  %1462 = vmatpush3.xpose.msk.msra.mxu1 %vm344_vm0, %v330_v3  ;;  %v319_v21 = vld [vmem:[%s2010_s5 + $0x38] sm:$0xff]  ;;  %v325_v22 = vmul.f32 0.17677669, %v317_v20  ;;  %v2112_v20 = vld [vmem:[%s2105_s25 + $0x28] sm:$0xff]  ;;  %s1689_s9 = scalar_lea.vmem %s2172_s6, 1024  ;;  %p2287_p7 = scmp.ne.s32.totalorder %s2275_s26, 0 }
  0x7d   : > { %1466 = vmatprep.subr.msk.mxu0 %vm344_vm0, %v333_v10  ;;  %1473 = vmatprep.subr.msk.mxu1 %vm344_vm0, %v335_v11  ;;  %v327_v23 = vmul.f32 0.17677669, %v319_v21  ;;  %v2116_v21 = vld [vmem:[%s2105_s25 + $0x38] sm:$0xff]  ;;  %p1690_p13 = scmp.ne.s32.totalorder %s2172_s6, %s1689_s9  ;;  %s1794_s29 = smov [#allocation9]  }
  0x7e   : > { %s1693_s30 = sshll.u32 %s1794_s29, 4  ;;  %s1694_s30 = int_to_ptr.vmem [resolvable:$false] %s1693_s30 }
  0x7f   : > { %1457 = vmatmul.mubr.msk.f32.vlgmr.msra.gmra.mxu0 %vm344_vm0, %v321_v12  ;;  %1464 = vmatmul.mubr.msk.f32.vlgmr.msra.gmra.mxu1 %vm344_vm0, %v323_v13  ;;  %p1691_p8 = pnand %p1690_p13, %p2287_p7  ;;  %s1695_s23 = scalar_lea.vmem %s1694_s30, 2048 }
  0x80   : > { %1467 = vmatpush3.xpose.msk.msra.mxu0 %vm344_vm0, %v333_v10  ;;  %1474 = vmatpush3.xpose.msk.msra.mxu1 %vm344_vm0, %v335_v11  ;;  %p1696_p1 = scmp.lt.s32.totalorder %s2172_s6, %s1694_s30  ;;  %p1697_p3 = scmp.lt.s32.totalorder %s1695_s23, %s1689_s9 }
  0x81   : > { %1468 = vmatprep.subr.msk.mxu0 %vm344_vm0, %v332_v16  ;;  %1475 = vmatprep.subr.msk.mxu1 %vm344_vm0, %v334_v17  ;;  %p1692_p10 = pneg %p1691_p8 }
  0x82   : > { %1470 = vmatprep.mubr.msk.f32.mxu0 %vm344_vm0, %v324_v18  ;;  %1477 = vmatprep.mubr.msk.f32.mxu1 %vm344_vm0, %v326_v19  ;;  %v339_v18 = vld [vmem:[%s2105_s25 + $0x18] sm:$0xff]  ;;  %v338_v19 = vld [vmem:[%s2105_s25 + $0x10] sm:$0xff]  ;;  %p1698_p9 = por %p1697_p3, %p1696_p1 }
  0x84   : > { %1469 = vmatpush3.xpose.msk.msra.mxu0 %vm344_vm0, %v332_v16  ;;  %1476 = vmatpush3.xpose.msk.msra.mxu1 %vm344_vm0, %v334_v17  ;;  %v337_v16 = vld [vmem:[%s2105_s25 + $0x8] sm:$0xff]  ;;  %v336_v17 = vld [vmem:[%s2105_s25] sm:$0xff]  ;;  %p1699_p6 = pnand %p1698_p9, %p1692_p10 }
  0x85   : > { %1480 = vmatprep.subr.mxu0 %v337_v16  ;;  %1487 = vmatprep.subr.mxu1 %v339_v18 }
  0x87   : > { %1471 = vmatmul.mubr.msk.f32.vlgmr.msra.gmra.mxu0 %vm344_vm0, %v325_v22  ;;  %1478 = vmatmul.mubr.msk.f32.vlgmr.msra.gmra.mxu1 %vm344_vm0, %v327_v23 }
  0x88   : > { %1481 = vmatpush3.msra.mxu0 %v337_v16  ;;  %1488 = vmatpush3.msra.mxu1 %v339_v18 }
  0x89   : > { %1482 = vmatprep.subr.mxu0 %v336_v17  ;;  %1489 = vmatprep.subr.mxu1 %v338_v19 }
  0x8a   : > { %1483 = vmatpush3.msra.mxu0 %v336_v17  ;;  %1490 = vmatpush3.msra.mxu1 %v338_v19 }
  0x8b   : > { %1494 = vmatprep.subr.mxu0 %v2112_v20  ;;  %1501 = vmatprep.subr.mxu1 %v2116_v21 }
 0x13f   : > { %v1458_v24 = vpop.f32.mrf.mxu0  ;;  %v1465_v25 = vpop.f32.mrf.mxu1 }
 0x140   : > { %v697_v26 = vsel %vm693_vm1, %v1458_v24, -inf  ;;  %v703_v29 = vsel %vm693_vm1, %v1465_v25, -inf }
 0x141   : > { %698 = vmax.xlane.f32.xlu1 %v697_v26  ;;  %v423_v27 = vpop.f32.mrf.mxu0  ;;  %v510_v30 = vpop.f32.mrf.mxu1 }
 0x142   : > { %v694_v28 = vsel %vm693_vm1, %v423_v27, -inf  ;;  %v700_v31 = vsel %vm693_vm1, %v510_v30, -inf }
 0x143   : > { %695 = vmax.xlane.f32.xlu0 %v694_v28 }
 0x145   : > { %704 = vmax.xlane.f32.xlu1 %v703_v29 }
 0x147   : > { %v1479_v32 = vpop.f32.mrf.mxu1  ;;  %701 = vmax.xlane.f32.xlu0 %v700_v31  ;;  %v1472_v33 = vpop.f32.mrf.mxu0 }
 0x148   : > { %v715_v38 = vsel %vm693_vm1, %v1479_v32, -inf  ;;  %v709_v39 = vsel %vm693_vm1, %v1472_v33, -inf }
 0x149   : > { %v597_v34 = vpop.f32.mrf.mxu0  ;;  %v684_v35 = vpop.f32.mrf.mxu1 }
 0x14a   : > { %v712_v36 = vsel %vm693_vm1, %v684_v35, -inf  ;;  %v706_v37 = vsel %vm693_vm1, %v597_v34, -inf }
 0x14b   : > { %713 = vmax.xlane.f32.xlu1 %v712_v36  ;;  %707 = vmax.xlane.f32.xlu0 %v706_v37 }
 0x14f   : > { %716 = vmax.xlane.f32.xlu1 %v715_v38  ;;  %710 = vmax.xlane.f32.xlu0 %v709_v39 }
 0x1ca   : > { %v699_v40 = vpop.xlane.xlu1 %698 }
 0x1cb   : > { %v719_v41 = vsub.f32 %v1458_v24, %v699_v40 }
 0x1cc   : > { %v696_v42 = vpop.xlane.xlu0 %695 }
 0x1cd   : > { %v728_v43 = vmul.f32 1.442695, %v719_v41  ;;  %v718_v44 = vsub.f32 %v423_v27, %v696_v42 }
 0x1ce   : > { %v705_v45 = vpop.xlane.xlu1 %704 }
 0x1cf   : > { %1573 = vpow2.f32 %v728_v43  ;;  %v726_v46 = vmul.f32 1.442695, %v718_v44  ;;  %v721_v47 = vsub.f32 %v1465_v25, %v705_v45 }
 0x1d0   : > { %v702_v48 = vpop.xlane.xlu0 %701 }
 0x1d1   : > { %1575 = vpow2.f32 %v726_v46  ;;  %v732_v49 = vmul.f32 1.442695, %v721_v47  ;;  %v720_v50 = vsub.f32 %v510_v30, %v702_v48 }
 0x1d3   : > { %1577 = vpow2.f32 %v732_v49  ;;  %v730_v51 = vmul.f32 1.442695, %v720_v50 }
 0x1d4   : > { %v714_v52 = vpop.xlane.xlu1 %713  ;;  %v708_v53 = vpop.xlane.xlu0 %707 }
 0x1d5   : > { %1579 = vpow2.f32 %v730_v51  ;;  %v724_v54 = vsub.f32 %v684_v35, %v714_v52  ;;  %v722_v55 = vsub.f32 %v597_v34, %v708_v53 }
 0x1d7   : > { %v738_v56 = vmul.f32 1.442695, %v724_v54  ;;  %v734_v57 = vmul.f32 1.442695, %v722_v55 }
 0x1d8   : > { %v717_v58 = vpop.xlane.xlu1 %716  ;;  %v711_v59 = vpop.xlane.xlu0 %710 }
 0x1d9   : > { %1581 = vpow2.f32 %v738_v56  ;;  %v725_v60 = vsub.f32 %v1479_v32, %v717_v58  ;;  %v723_v61 = vsub.f32 %v1472_v33, %v711_v59 }
 0x1da   : > { %1583 = vpow2.f32 %v734_v57 }
 0x1db   : > { %v740_v62 = vmul.f32 1.442695, %v725_v60  ;;  %v736_v63 = vmul.f32 1.442695, %v723_v61 }
 0x1dc   : > { %v2072_v0 = vpop.eup %1573 }
 0x1dd   : > { %1585 = vpow2.f32 %v740_v62  ;;  %v745_v1 = vsel %vm693_vm1, %v2072_v0, 0.0 }
 0x1de   : > { %v2076_v2 = vpop.eup %1575  ;;  %1587 = vpow2.f32 %v736_v63  ;;  %746 = vadd.xlane.f32.xlu0 %v745_v1 }
 0x1df   : > { %v742_v5 = vsel %vm693_vm1, %v2076_v2, 0.0 }
 0x1e0   : > { %v2078_v3 = vpop.eup %1577 }
 0x1e1   : > { %v751_v4 = vsel %vm693_vm1, %v2078_v3, 0.0 }
 0x1e2   : > { %v2084_v6 = vpop.eup %1579  ;;  %752 = vadd.xlane.f32.xlu1 %v751_v4  ;;  %743 = vadd.xlane.f32.xlu0 %v742_v5 }
 0x1e3   : > { %v748_v7 = vsel %vm693_vm1, %v2084_v6, 0.0 }
 0x1e6   : > { %v2088_v8 = vpop.eup %1581  ;;  %749 = vadd.xlane.f32.xlu1 %v748_v7 }
 0x1e7   : > { %v2090_v9 = vpop.eup %1583  ;;  %v760_v11 = vsel %vm693_vm1, %v2088_v8, 0.0 }
 0x1e8   : > { %v754_v10 = vsel %vm693_vm1, %v2090_v9, 0.0 }
 0x1e9   : > { %755 = vadd.xlane.f32.xlu0 %v754_v10 }
 0x1ea   : > { %v2096_v12 = vpop.eup %1585  ;;  %761 = vadd.xlane.f32.xlu1 %v760_v11 }
 0x1eb   : > { %v2098_v13 = vpop.eup %1587  ;;  %v763_v15 = vsel %vm693_vm1, %v2096_v12, 0.0 }
 0x1ec   : > { %v757_v14 = vsel %vm693_vm1, %v2098_v13, 0.0 }
 0x1ed   : > { %758 = vadd.xlane.f32.xlu0 %v757_v14 }
 0x1ee   : > { %764 = vadd.xlane.f32.xlu1 %v763_v15 }
 0x267   : > { %v747_v22 = vpop.xlane.xlu0 %746 }
 0x268   : > { %1589 = vrcp.f32 %v747_v22 }
 0x26b   : > { %v753_v23 = vpop.xlane.xlu1 %752  ;;  %v744_v24 = vpop.xlane.xlu0 %743 }
 0x26c   : > { %1591 = vrcp.f32 %v753_v23 }
 0x26d   : > { %1593 = vrcp.f32 %v744_v24 }
 0x26f   : > { %v750_v25 = vpop.xlane.xlu1 %749 }
 0x270   : > { %1595 = vrcp.f32 %v750_v25 }
 0x272   : > { %v756_v26 = vpop.xlane.xlu0 %755 }
 0x273   : > { %1597 = vrcp.f32 %v756_v26  ;;  %v762_v27 = vpop.xlane.xlu1 %761 }
 0x274   : > { %1599 = vrcp.f32 %v762_v27 }
 0x275   : > { %v1590_v28 = vpop.eup %1589 }
 0x276   : > { %v775_v29 = vmul.f32 %v1590_v28, %v747_v22  ;;  %v759_v30 = vpop.xlane.xlu0 %758 }
 0x277   : > { %1601 = vrcp.f32 %v759_v30  ;;  %v2119_v31 = vpop.xlane.xlu1 %764 }
 0x278   : > { %v783_v32 = vsub.f32 2.0, %v775_v29  ;;  %1603 = vrcp.f32 %v2119_v31 }
 0x279   : > { %v1592_v33 = vpop.eup %1591 }
 0x27a   : > { %v1594_v34 = vpop.eup %1593  ;;  %v791_v35 = vmul.f32 %v1590_v28, %v783_v32  ;;  %v777_v36 = vmul.f32 %v1592_v33, %v753_v23  ;;  %v342_v32 = vld [vmem:[%s2105_s25 + $0x30] sm:$0xff] }
 0x27b   : > { %v774_v37 = vmul.f32 %v1594_v34, %v744_v24 }
 0x27c   : > { %v799_v38 = vmul.f32 %v791_v35, %v747_v22  ;;  %v785_v39 = vsub.f32 2.0, %v777_v36 }
 0x27d   : > { %v1596_v40 = vpop.eup %1595  ;;  %v782_v41 = vsub.f32 2.0, %v774_v37 }
 0x27e   : > { %v807_v42 = vsub.f32 2.0, %v799_v38  ;;  %v793_v43 = vmul.f32 %v1592_v33, %v785_v39  ;;  %v776_v44 = vmul.f32 %v1596_v40, %v750_v25 }
 0x27f   : > { %v790_v45 = vmul.f32 %v1594_v34, %v782_v41 }
 0x280   : > { %v1598_v46 = vpop.eup %1597  ;;  %v815_v47 = vmul.f32 %v807_v42, %v791_v35  ;;  %v801_v48 = vmul.f32 %v793_v43, %v753_v23  ;;  %v784_v49 = vsub.f32 2.0, %v776_v44 }
 0x281   : > { %v1600_v50 = vpop.eup %1599  ;;  %v798_v51 = vmul.f32 %v790_v45, %v744_v24  ;;  %v778_v52 = vmul.f32 %v1598_v46, %v756_v26 }
 0x282   : > { %v823_v53 = vmul.f32 %v2072_v0, %v815_v47  ;;  %v809_v54 = vsub.f32 2.0, %v801_v48  ;;  %v792_v55 = vmul.f32 %v1596_v40, %v784_v49  ;;  %v780_v56 = vmul.f32 %v1600_v50, %v762_v27 }
 0x283   : > { %v806_v57 = vsub.f32 2.0, %v798_v51  ;;  %v786_v58 = vsub.f32 2.0, %v778_v52 }
 0x284   : > { %v1602_v59 = vpop.eup %1601  ;;  %831 = vst.msk [vmem:[%s2124_s13 + $0x8] sm:$0xff] %vm693_vm1, %v823_v53  ;;  %v817_v60 = vmul.f32 %v809_v54, %v793_v43  ;;  %v800_v61 = vmul.f32 %v792_v55, %v750_v25  ;;  %v788_v62 = vsub.f32 2.0, %v780_v56 }
 0x285   : > { %v1604_v63 = vpop.eup %1603  ;;  %v814_v1 = vmul.f32 %v806_v57, %v790_v45  ;;  %v794_v4 = vmul.f32 %v1598_v46, %v786_v58  ;;  %v779_v0 = vmul.f32 %v1602_v59, %v759_v30 }
 0x286   : > { %v825_v5 = vmul.f32 %v2078_v3, %v817_v60  ;;  %v808_v7 = vsub.f32 2.0, %v800_v61  ;;  %v796_v10 = vmul.f32 %v1600_v50, %v788_v62  ;;  %v781_v11 = vmul.f32 %v1604_v63, %v2119_v31  ;;  %v340_v3 = vld [vmem:[%s2105_s25 + $0x20] sm:$0xff] }
 0x287   : > { %v802_v14 = vmul.f32 %v794_v4, %v756_v26  ;;  %v787_v15 = vsub.f32 2.0, %v779_v0  ;;  %v822_v16 = vmul.f32 %v2076_v2, %v814_v1 }
 0x288   : > { %833 = vst.msk [vmem:[%s2124_s13 + $0x18] sm:$0xff] %vm693_vm1, %v825_v5  ;;  %v816_v17 = vmul.f32 %v808_v7, %v792_v55  ;;  %v804_v18 = vmul.f32 %v796_v10, %v762_v27  ;;  %v789_v19 = vsub.f32 2.0, %v781_v11 }
 0x289   : > { %v810_v22 = vsub.f32 2.0, %v802_v14  ;;  %v795_v23 = vmul.f32 %v1602_v59, %v787_v15  ;;  %830 = vst.msk [vmem:[%s2124_s13] sm:$0xff] %vm693_vm1, %v822_v16  ;;  %1484 = vmatprep.mubr.msk.f32.mxu0 %vm693_vm1, %v822_v16 }
 0x28a   : > { %v812_v24 = vsub.f32 2.0, %v804_v18  ;;  %v797_v25 = vmul.f32 %v1604_v63, %v789_v19  ;;  %1485 = vmatmul.mubr.msk.f32.vlgmr.msra.gmra.mxu0 %vm693_vm1, %v823_v53  ;;  %v824_v2 = vmul.f32 %v2084_v6, %v816_v17 }
 0x28b   : > { %v818_v26 = vmul.f32 %v810_v22, %v794_v4  ;;  %v803_v28 = vmul.f32 %v795_v23, %v759_v30  ;;  %1495 = vmatpush3.msra.mxu0 %v2112_v20 }
 0x28c   : > { %v820_v27 = vmul.f32 %v812_v24, %v796_v10  ;;  %v805_v29 = vmul.f32 %v797_v25, %v2119_v31  ;;  %832 = vst.msk [vmem:[%s2124_s13 + $0x10] sm:$0xff] %vm693_vm1, %v824_v2  ;;  %1491 = vmatprep.mubr.msk.f32.mxu1 %vm693_vm1, %v824_v2  ;;  %1496 = vmatprep.subr.mxu0 %v340_v3 }
 0x28d   : > { %v811_v33 = vsub.f32 2.0, %v803_v28  ;;  %1492 = vmatmul.mubr.msk.f32.vlgmr.msra.gmra.mxu1 %vm693_vm1, %v825_v5  ;;  %v826_v6 = vmul.f32 %v2090_v9, %v818_v26  ;;  %1497 = vmatpush3.msra.mxu0 %v340_v3 }
 0x28e   : > { %v813_v30 = vsub.f32 2.0, %v805_v29  ;;  %1502 = vmatpush3.msra.mxu1 %v2116_v21  ;;  %v828_v20 = vmul.f32 %v2088_v8, %v820_v27 }
 0x28f   : > { %v819_v31 = vmul.f32 %v811_v33, %v795_v23  ;;  %834 = vst.msk [vmem:[%s2124_s13 + $0x20] sm:$0xff] %vm693_vm1, %v826_v6  ;;  %1498 = vmatprep.mubr.msk.f32.mxu0 %vm693_vm1, %v826_v6  ;;  %1503 = vmatprep.subr.mxu1 %v342_v32 }
 0x290   : > { %v821_v34 = vmul.f32 %v813_v30, %v797_v25  ;;  %836 = vst.msk [vmem:[%s2124_s13 + $0x30] sm:$0xff] %vm693_vm1, %v828_v20  ;;  %1505 = vmatprep.mubr.msk.f32.mxu1 %vm693_vm1, %v828_v20  ;;  %1504 = vmatpush3.msra.mxu1 %v342_v32 }
 0x291   : > { %v827_v9 = vmul.f32 %v2098_v13, %v819_v31 }
 0x292   : > { %v829_v8 = vmul.f32 %v2096_v12, %v821_v34 }
 0x293   : > { %835 = vst.msk [vmem:[%s2124_s13 + $0x28] sm:$0xff] %vm693_vm1, %v827_v9  ;;  %1499 = vmatmul.mubr.msk.f32.vlgmr.msra.gmra.mxu0 %vm693_vm1, %v827_v9 }
 0x294   : > { %837 = vst.msk [vmem:[%s2124_s13 + $0x38] sm:$0xff] %vm693_vm1, %v829_v8  ;;  %1506 = vmatmul.mubr.msk.f32.vlgmr.msra.gmra.mxu1 %vm693_vm1, %v829_v8 }
 0x295   : > { %1702 = shalt.err (!%p1699_p6)
}
 0x296   : > { %s1703_s11 = scalar_lea.hbm %s2169_s8, 1024  ;;  %s1707_s12 = scalar_lea.hbm %s2264_s4, 2048 }
 0x297   : > { %p1704_p12 = scmp.ne.s32.totalorder %s2169_s8, %s1703_s11  ;;  %p1708_p4 = scmp.lt.s32.totalorder %s2169_s8, %s2264_s4 }
 0x298   : > { %p1709_p2 = scmp.lt.s32.totalorder %s1707_s12, %s1703_s11 }
 0x299   : > { %p1705_p0 = pnand %p1704_p12, %p2287_p7 }
 0x29a   : > { %p1710_p5 = por %p1709_p2, %p1708_p4 }
 0x29b   : > { %p1706_p11 = pneg %p1705_p0 }
 0x29d   : > { %p1711_p13 = pnand %p1710_p5, %p1706_p11 }
 0x29f   : > { %1714 = shalt.err (!%p1711_p13)
}
 0x2a0   : > { %s1795_s25 = smov 128   ;;  %s1796_s13 = smov 8  }
 0x2a1   : > { %1515 = dma.vmem_to_hbm [thread:$0]  (%p2287_p7), %s2172_s6, 1024, %s2169_s8, %s1176_s22, %s1795_s25, %s1795_s25, %s1796_s13  }
 0x2a2   : > { %s299_s28 = scalar_lea.vmem [#allocation8], %s2006_s24  ;;  %s2214_s6 = scalar_lea.hbm %s2263_s3, %s1417_s20 }
 0x2a3   : > { %s1190_s7 = sshll.u32 %s299_s28, 4  ;;  %s1171_s22 = scalar_lea.sflag [#allocation4], %s2003_s0  ;;  %s2205_s7 = int_to_ptr.vmem [resolvable:$true] %s1190_s7 }
 0x2a4   : > { %s1715_s9 = scalar_lea.vmem %s2205_s7, 1024  ;;  %s1797_s29 = smov [#allocation8]  }
 0x2a5   : > { %p1716_p8 = scmp.ne.s32.totalorder %s2205_s7, %s1715_s9  ;;  %s1719_s30 = sshll.u32 %s1797_s29, 4  ;;  %s1720_s30 = int_to_ptr.vmem [resolvable:$false] %s1719_s30 }
 0x2a6   : > { %s1721_s19 = scalar_lea.vmem %s1720_s30, 2048  ;;  %p1722_p3 = scmp.lt.s32.totalorder %s2205_s7, %s1720_s30 }
 0x2a7   : > { %p1717_p10 = pnand %p1716_p8, %p2287_p7  ;;  %p1723_p9 = scmp.lt.s32.totalorder %s1721_s19, %s1715_s9 }
 0x2a9   : > { %p1718_p1 = pneg %p1717_p10  ;;  %p1724_p6 = por %p1723_p9, %p1722_p3 }
 0x2ab   : > { %p1725_p12 = pnand %p1724_p6, %p1718_p1 }
 0x34a   : > { %v1486_v12 = vpop.f32.mrf.mxu0 }
 0x34b   : > { %1163 = vst.msk [vmem:[%s299_s28 + $0x8] sm:$0xff] %vm344_vm0, %v1486_v12 }
 0x34c   : > { %v910_v13 = vpop.f32.mrf.mxu0 }
 0x34d   : > { %1162 = vst.msk [vmem:[%s299_s28] sm:$0xff] %vm344_vm0, %v910_v13  ;;  %v1493_v21 = vpop.f32.mrf.mxu1 }
 0x34e   : > { %1165 = vst.msk [vmem:[%s299_s28 + $0x18] sm:$0xff] %vm344_vm0, %v1493_v21 }
 0x34f   : > { %v991_v35 = vpop.f32.mrf.mxu1 }
 0x350   : > { %1164 = vst.msk [vmem:[%s299_s28 + $0x10] sm:$0xff] %vm344_vm0, %v991_v35 }
 0x353   : > { %v1500_v36 = vpop.f32.mrf.mxu0 }
 0x354   : > { %1167 = vst.msk [vmem:[%s299_s28 + $0x28] sm:$0xff] %vm344_vm0, %v1500_v36  ;;  %v1507_v37 = vpop.f32.mrf.mxu1 }
 0x355   : > { %v1072_v38 = vpop.f32.mrf.mxu0  ;;  %1169 = vst.msk [vmem:[%s299_s28 + $0x38] sm:$0xff] %vm344_vm0, %v1507_v37 }
 0x356   : > { %1166 = vst.msk [vmem:[%s299_s28 + $0x20] sm:$0xff] %vm344_vm0, %v1072_v38  ;;  %v1153_v39 = vpop.f32.mrf.mxu1 }
 0x357   : > { %1168 = vst.msk [vmem:[%s299_s28 + $0x30] sm:$0xff] %vm344_vm0, %v1153_v39 }
 0x358   : > { %1728 = shalt.err (!%p1725_p12)
}
 0x359   : > { %s1729_s20 = scalar_lea.hbm %s2214_s6, 1024  ;;  %s1733_s11 = scalar_lea.hbm %s2263_s3, 2048 }
 0x35a   : > { %p1730_p0 = scmp.ne.s32.totalorder %s2214_s6, %s1729_s20  ;;  %p1734_p2 = scmp.lt.s32.totalorder %s2214_s6, %s2263_s3 }
 0x35b   : > { %p1735_p5 = scmp.lt.s32.totalorder %s1733_s11, %s1729_s20 }
 0x35c   : > { %p1731_p11 = pnand %p1730_p0, %p2287_p7 }
 0x35d   : > { %p1736_p13 = por %p1735_p5, %p1734_p2 }
 0x35e   : > { %p1732_p4 = pneg %p1731_p11 }
 0x360   : > { %p1737_p8 = pnand %p1736_p13, %p1732_p4 }
 0x362   : > { %1740 = shalt.err (!%p1737_p8)
}
 0x363   : > { %1514 = dma.vmem_to_hbm [thread:$0]  (%p2287_p7), %s2205_s7, 1024, %s2214_s6, %s1171_s22, %s1795_s25, %s1795_s25, %s1796_s13  }
 0x364 PF: > { %s1222_s12 = sand.u32 1, %s1775_s15   ;;  %p2288_p10 = scmp.ne.s32.totalorder %s2276_s27, 0 }
 0x365   : > { %p2289_p1 = scmp.ge.s32.totalorder %s1787_s18, 2  ;;  %s1223_s10 = scalar_lea.sflag [#allocation4], %s1222_s12 }
 0x367   : > { %p1529_p3 = pnand %p2289_p1, %p2288_p10 }
 0x369   : > { %p1530_p9 = pneg %p1529_p3 }
 0x36b   : > { %1766 = dma.done.wait (%p1530_p9), %s1223_s10, 1024  }
 0x36c   : > { %1768 = vsyncadd (%p1530_p9), %s1223_s10, 4294966272  ;;  %s1232_s1 = scalar_lea.sflag [#allocation10], %s1222_s12 }
 0x36d   : > { %1770 = dma.done.wait (%p1530_p9), %s1232_s1, 1024  }
 0x36e   : > { %1772 = vsyncadd (%p1530_p9), %s1232_s1, 4294966272  ;;  %s2290_s26 = sld [smem:[#allocation15_spill]]  ;;  %p24_p7 = scmp.ge.s32.totalorder %s1848_s21, 4  }
 0x36f   : > { %s2291_s15 = smov %s1779_s16  ;;  %s2292_s16 = smov %s1783_s17 }
 0x370   : > { %s2294_s18 = smov %s1848_s21  ;;  %26 = sbr.rel (!%p24_p7) target bundleno = 12 (0xc), region = 118 }
 0x374   : > { %s2293_s17 = smov %s2290_s26 }
 0x375   :  { %1237 = vsyncpa [#allocation3], 1 }
 0x376   :  { %1239 = vsyncpa [#allocation3 + $0x1], 1 }
 0x377   :  { %1240 = vsyncpa [#allocation6], 1 }
 0x378   :  { %1242 = vsyncpa [#allocation6 + $0x1], 1 }
 0x379   :  { %1243 = vsyncpa [#allocation4], 1 }
 0x37a   :  { %1245 = vsyncpa [#allocation4 + $0x1], 1 }
 0x37b   :  { %1246 = vsyncpa [#allocation10], 1 }
 0x37c   :  { %1248 = vsyncpa [#allocation10 + $0x1], 1 }

</bundles_post_ra>
